<compile_context>
chip_gen: v5e
topology: v5e:2x2
jax: 0.10.0
libtpu: 0.0.40
codegen_flags: <defaults>
</compile_context>

<pallas_src>
import functools

import jax
import jax.numpy as jnp
from jax import lax
from jax.experimental import pallas as pl
from jax.experimental.pallas import tpu as pltpu

_INV_SQRT2 = 0.7071067811865476


def _gelu_exact(x):
    # exact (erf) GELU, matching torch.nn.functional.gelu default.
    # (tanh-approx would move this to the EUP slot on v5e, but exact keeps
    # parity with the torch module.)
    return 0.5 * x * (1.0 + lax.erf(x * _INV_SQRT2))


def moe_ffn_kernel(x_ref,
                   wr1_ref, br1_ref, ln_g_ref, ln_b_ref, wr2_ref, br2_ref,
                   w1a_ref, b1a_ref, w1b_ref, b1b_ref, w2_ref, b2_ref,
                   o_ref,
                   mask_ref, wgt_ref,
                   *, num_experts, top_k):
    e = pl.program_id(1)
    f = pl.program_id(2)

    # ---- router + top-k routing mask: once per token tile ----------------
    @pl.when(jnp.logical_and(e == 0, f == 0))
    def _():
        xb = x_ref[...]                                   # already bf16
        h = jnp.dot(xb, wr1_ref[...],
                    preferred_element_type=jnp.float32) + br1_ref[...]
        mu = jnp.mean(h, axis=-1, keepdims=True)
        var = jnp.mean((h - mu) ** 2, axis=-1, keepdims=True)
        hn = (h - mu) * lax.rsqrt(var + 1e-5)
        hn = hn * ln_g_ref[...] + ln_b_ref[...]
        hn = _gelu_exact(hn)
        logits = jnp.dot(hn.astype(jnp.bfloat16), wr2_ref[...],
                         preferred_element_type=jnp.float32) + br2_ref[...]

        # The softmax denominator cancels exactly in the top-k renorm, so we
        # select / renormalize directly on exp(logits - max): selection order
        # and final weights are identical, and no approx reciprocal is needed.
        m = jnp.max(logits, axis=-1, keepdims=True)
        ex = jnp.exp(logits - m)

        tt = ex.shape[0]
        iota = lax.broadcasted_iota(jnp.int32, (tt, num_experts), 1)
        work = ex
        sels = []
        topk_sum = jnp.zeros((tt, 1), jnp.float32)
        for _ in range(top_k):
            cur = jnp.max(work, axis=-1, keepdims=True)
            first = jnp.min(jnp.where(work == cur, iota, num_experts),
                            axis=-1, keepdims=True)
            onehot = (iota == first).astype(jnp.float32)
            sels.append((onehot, cur))
            topk_sum = topk_sum + cur
            work = jnp.where(onehot > 0, -jnp.inf, work)
        inv_sum = 1.0 / topk_sum                          # exact, once per tile
        mask = jnp.zeros((tt, num_experts), jnp.float32)
        for onehot, cur in sels:
            mask = mask + onehot * (cur * inv_sum)
        mask_ref[...] = mask

        # Output block index is constant across the expert/FF axes, so the
        # output tile stays resident: accumulate straight into it.
        o_ref[...] = jnp.zeros_like(o_ref)

    # ---- per-expert routing weight + linear2 bias: once per expert -------
    @pl.when(f == 0)
    def _():
        # Column e of the routing mask via a tiny one-hot matmul (MXU slack)
        # instead of a (tt, E) iota/where/select + cross-lane reduce per step.
        sel = (lax.broadcasted_iota(jnp.int32, (num_experts, 1), 0) == e
               ).astype(jnp.float32)
        wgt_ref[...] = jnp.dot(mask_ref[...], sel,
                               preferred_element_type=jnp.float32)
        o_ref[...] = o_ref[...] + b2_ref[0] * wgt_ref[...]

    # ---- GeGLU expert `e`, FF tile `f` (bf16 MXU operands, f32 acc) -------
    # TODO(synk): dropout is identity (eval mode); the aux load-balancing loss
    # (training-only bookkeeping) is intentionally not computed here.
    # TODO(synk): for large num_experts, route in a tiny pre-pass and feed a
    # per-tile hit-expert list via scalar prefetch so dead experts' weight DMA
    # and matmuls are skipped entirely (top_k << E).
    xb = x_ref[...]
    h1 = jnp.dot(xb, w1a_ref[0], preferred_element_type=jnp.float32) + b1a_ref[0]
    h2 = jnp.dot(xb, w1b_ref[0], preferred_element_type=jnp.float32) + b1b_ref[0]
    g = (h1 * _gelu_exact(h2)).astype(jnp.bfloat16)
    y = jnp.dot(g, w2_ref[0], preferred_element_type=jnp.float32)
    o_ref[...] = o_ref[...] + y * wgt_ref[...]


def _pick_ff_tile(ff, target):
    """Largest multiple-of-128 divisor of `ff` that is <= target (else ff)."""
    if ff <= target:
        return ff
    best = ff                        # fall back to untiled if nothing fits
    for d in range(128, target + 1, 128):
        if ff % d == 0:
            best = d
    return best


def moe_feedforward(x, params, *, num_experts, top_k,
                    token_tile=512, ff_tile=512):
    """x: (B, S, D) -> (B, S, D)."""
    B, S, D = x.shape
    N = B * S
    E = num_experts
    Dh = params["wr1"].shape[1]
    FF = params["w1a"].shape[-1]

    # Token tile: multiple of 16 (bf16 sublane packing); pad tokens if needed.
    # NOTE: v7x megacore only engages both TCs when there are >= 2 token tiles.
    tt = max(16, min(token_tile, ((N + 15) // 16) * 16))
    tt = (tt // 16) * 16
    Np = ((N + tt - 1) // tt) * tt
    n_tiles = Np // tt

    # FF tile (innermost grid axis): bounds per-step weight residency.
    ft = _pick_ff_tile(FF, ff_tile)
    n_ff = FF // ft

    # x -> bf16 once here (halves x DMA, removes per-step casts in kernel).
    xf = x.reshape(N, D).astype(jnp.bfloat16)
    if Np != N:
        xf = jnp.pad(xf, ((0, Np - N), (0, 0)))

    bf = jnp.bfloat16
    wr1 = params["wr1"].astype(bf)
    wr2 = params["wr2"].astype(bf)
    w1a = params["w1a"].astype(bf)
    w1b = params["w1b"].astype(bf)
    w2 = params["w2"].astype(bf)

    kernel = functools.partial(moe_ffn_kernel, num_experts=E, top_k=top_k)

    def fixed(shape):
        n = len(shape)
        return pl.BlockSpec(shape, lambda i, e, f: (0,) * n)

    # VMEM budget: ~85% of per-core physical VMEM (headroom for semaphores /
    # internal scratch): ~54 MiB on v7x, ~108 MiB on v5e/v6e.
    try:
        vmem_cap = pltpu.get_tpu_info().vmem_capacity_bytes
    except Exception:
        vmem_cap = 64 * 1024 * 1024        # conservative (v7x per-TC) fallback
    vmem_limit = int(vmem_cap * 0.85)

    flops = 2 * Np * E * 3 * D * FF + 2 * Np * (D * Dh + Dh * E)
    transcendentals = Np * E * FF + Np * Dh + Np * E
    bytes_accessed = (
        Np * D * 2 + Np * D * 4                                # x read + out write
        + (w1a.size + w1b.size + w2.size) * 2 * n_tiles        # expert weights, re-streamed per token tile
        + (params["b1a"].size + params["b1b"].size
           + params["b2"].size) * 4 * n_tiles
        + (wr1.size + wr2.size) * 2                            # router weights (resident)
        + (params["br1"].size + params["br2"].size
           + params["ln_g"].size + params["ln_b"].size) * 4)

    out = pl.pallas_call(
        kernel,
        out_shape=jax.ShapeDtypeStruct((Np, D), jnp.float32),
        grid_spec=pltpu.PrefetchScalarGridSpec(
            num_scalar_prefetch=0,
            # tokens (parallel / megacore), experts, FF tiles (reductions)
            grid=(n_tiles, E, n_ff),
            in_specs=[
                pl.BlockSpec((tt, D), lambda i, e, f: (i, 0)),          # x tile
                fixed((D, Dh)), fixed((1, Dh)), fixed((1, Dh)), fixed((1, Dh)),
                fixed((Dh, E)), fixed((1, E)),                          # router params
                pl.BlockSpec((1, D, ft), lambda i, e, f: (e, 0, f)),    # w1 x1-half (streamed)
                pl.BlockSpec((1, 1, ft), lambda i, e, f: (e, 0, f)),    # b1 x1-half
                pl.BlockSpec((1, D, ft), lambda i, e, f: (e, 0, f)),    # w1 x2-half (streamed)
                pl.BlockSpec((1, 1, ft), lambda i, e, f: (e, 0, f)),    # b1 x2-half
                pl.BlockSpec((1, ft, D), lambda i, e, f: (e, f, 0)),    # w2 (streamed)
                pl.BlockSpec((1, 1, D), lambda i, e, f: (e, 0, 0)),     # b2
            ],
            out_specs=pl.BlockSpec((tt, D), lambda i, e, f: (i, 0)),
            scratch_shapes=[pltpu.VMEM((tt, E), jnp.float32),   # routing mask
                            pltpu.VMEM((tt, 1), jnp.float32)],  # expert weight column
        ),
        compiler_params=pltpu.CompilerParams(
            dimension_semantics=("parallel", "arbitrary", "arbitrary"),
            vmem_limit_bytes=vmem_limit),
        cost_estimate=pl.CostEstimate(flops=flops,
                                      transcendentals=transcendentals,
                                      bytes_accessed=bytes_accessed),
    )(xf, wr1, params["br1"], params["ln_g"], params["ln_b"],
      wr2, params["br2"],
      w1a, params["b1a"], w1b, params["b1b"], w2, params["b2"])

    return out[:N].reshape(B, S, D).astype(x.dtype)


def moe_reference(x, params, *, num_experts, top_k):
    """Pure-JAX reference with matching (bf16-operand) semantics."""
    f32, bf = jnp.float32, jnp.bfloat16
    xb = x.astype(bf)
    wr1 = params["wr1"].astype(bf)
    wr2 = params["wr2"].astype(bf)

    h = jnp.dot(xb, wr1, preferred_element_type=f32) + params["br1"][0]
    mu = h.mean(-1, keepdims=True)
    var = ((h - mu) ** 2).mean(-1, keepdims=True)
    hn = (h - mu) / jnp.sqrt(var + 1e-5)
    hn = hn * params["ln_g"][0] + params["ln_b"][0]
    hn = _gelu_exact(hn)
    logits = jnp.dot(hn.astype(bf), wr2,
                     preferred_element_type=f32) + params["br2"][0]
    probs = jax.nn.softmax(logits, axis=-1)
    topv, topi = jax.lax.top_k(probs, top_k)
    topv = topv / topv.sum(-1, keepdims=True)
    onehot = jax.nn.one_hot(topi, num_experts, dtype=probs.dtype)
    mask = (onehot * topv[..., None]).sum(-2)                   # (B, S, E)

    out = jnp.zeros_like(x)
    for e in range(num_experts):
        w1a = params["w1a"][e].astype(bf)
        w1b = params["w1b"][e].astype(bf)
        w2 = params["w2"][e].astype(bf)
        h1 = jnp.dot(xb, w1a, preferred_element_type=f32) + params["b1a"][e, 0]
        h2 = jnp.dot(xb, w1b, preferred_element_type=f32) + params["b1b"][e, 0]
        g = h1 * _gelu_exact(h2)
        y = jnp.dot(g.astype(bf), w2,
                    preferred_element_type=f32) + params["b2"][e, 0]
        out = out + y * mask[..., e:e + 1]
    return out


if __name__ == "__main__":
    B, S, D, FF, E, K = 2, 8, 32, 64, 4, 2
    Dh = D // 2

    key = jax.random.PRNGKey(0)
    keys = jax.random.split(key, 16)

    def init(k, shape, fan_in):
        return jax.random.normal(k, shape, jnp.float32) / jnp.sqrt(float(fan_in))

    # Deterministic synthetic parameters (shapes match the torch module):
    #  router: Linear(D, D/2) -> LayerNorm(D/2) -> GELU -> Linear(D/2, E)
    #  expert i: linear1(D, 2*FF) split into x1/x2 halves, linear2(FF, D)
    params = {
        "wr1": init(keys[0], (D, Dh), D),
        "br1": init(keys[1], (1, Dh), D),
        "ln_g": jnp.ones((1, Dh), jnp.float32),
        "ln_b": jnp.zeros((1, Dh), jnp.float32),
        "wr2": init(keys[2], (Dh, E), Dh),
        "br2": init(keys[3], (1, E), Dh),
        "w1a": init(keys[4], (E, D, FF), D),
        "b1a": init(keys[5], (E, 1, FF), D),
        "w1b": init(keys[6], (E, D, FF), D),
        "b1b": init(keys[7], (E, 1, FF), D),
        "w2": init(keys[8], (E, FF, D), FF),
        "b2": init(keys[9], (E, 1, D), FF),
    }
    x = jax.random.normal(keys[10], (B, S, D), jnp.float32)

    out = moe_feedforward(x, params, num_experts=E, top_k=K)
    out = jax.block_until_ready(out)

    ref = jax.block_until_ready(
        moe_reference(x, params, num_experts=E, top_k=K))

    assert out.shape == (B, S, D)
    err = float(jnp.max(jnp.abs(out - ref)))
    if not jnp.allclose(out, ref, atol=2e-2, rtol=2e-2):
        raise AssertionError(f"kernel/reference mismatch, max abs err={err}")

    print("KERNEL_OK")
</pallas_src>

<mosaic_0001>
module attributes {stable_mosaic.version = 11 : i64} {
  func.func @moe_ffn_kernel(%arg0: i32, %arg1: i32, %arg2: i32, %arg3: memref<16x32xbf16, #tpu.memory_space<vmem>>, %arg4: memref<32x16xbf16, #tpu.memory_space<vmem>>, %arg5: memref<1x16xf32, #tpu.memory_space<vmem>>, %arg6: memref<1x16xf32, #tpu.memory_space<vmem>>, %arg7: memref<1x16xf32, #tpu.memory_space<vmem>>, %arg8: memref<16x4xbf16, #tpu.memory_space<vmem>>, %arg9: memref<1x4xf32, #tpu.memory_space<vmem>>, %arg10: memref<1x32x64xbf16, #tpu.memory_space<vmem>>, %arg11: memref<1x1x64xf32, #tpu.memory_space<vmem>>, %arg12: memref<1x32x64xbf16, #tpu.memory_space<vmem>>, %arg13: memref<1x1x64xf32, #tpu.memory_space<vmem>>, %arg14: memref<1x64x32xbf16, #tpu.memory_space<vmem>>, %arg15: memref<1x1x32xf32, #tpu.memory_space<vmem>>, %arg16: memref<16x32xf32, #tpu.memory_space<vmem>>, %arg17: memref<16x4xf32, #tpu.memory_space<vmem>>, %arg18: memref<16x1xf32, #tpu.memory_space<vmem>>) attributes {dimension_semantics = [#tpu.dimension_semantics<parallel>, #tpu.dimension_semantics<arbitrary>, #tpu.dimension_semantics<arbitrary>], iteration_bounds = array<i64: 1, 4, 1>, scalar_prefetch = 0 : i64, scratch_operands = 2 : i64, tpu.core_type = #tpu.core_type<tc>, window_params = [{transform_indices = @transform_0, window_bounds = array<i64: 16, 32>}, {pipeline_mode = #tpu.pipeline_mode<synchronous>, transform_indices = @transform_1, window_bounds = array<i64: 32, 16>}, {pipeline_mode = #tpu.pipeline_mode<synchronous>, transform_indices = @transform_2, window_bounds = array<i64: 1, 16>}, {pipeline_mode = #tpu.pipeline_mode<synchronous>, transform_indices = @transform_3, window_bounds = array<i64: 1, 16>}, {pipeline_mode = #tpu.pipeline_mode<synchronous>, transform_indices = @transform_4, window_bounds = array<i64: 1, 16>}, {pipeline_mode = #tpu.pipeline_mode<synchronous>, transform_indices = @transform_5, window_bounds = array<i64: 16, 4>}, {pipeline_mode = #tpu.pipeline_mode<synchronous>, transform_indices = @transform_6, window_bounds = array<i64: 1, 4>}, {transform_indices = @transform_7, window_bounds = array<i64: 1, 32, 64>}, {transform_indices = @transform_8, window_bounds = array<i64: 1, 1, 64>}, {transform_indices = @transform_9, window_bounds = array<i64: 1, 32, 64>}, {transform_indices = @transform_10, window_bounds = array<i64: 1, 1, 64>}, {transform_indices = @transform_11, window_bounds = array<i64: 1, 64, 32>}, {transform_indices = @transform_12, window_bounds = array<i64: 1, 1, 32>}, {transform_indices = @transform_13, window_bounds = array<i64: 16, 32>}]} {
    %c0_i32 = arith.constant 0 : i32
    %0 = arith.cmpi eq, %arg1, %c0_i32 : i32
    %c0_i32_0 = arith.constant 0 : i32
    %1 = arith.cmpi eq, %arg2, %c0_i32_0 : i32
    %2 = arith.andi %0, %1 : i1
    %3 = arith.extui %2 : i1 to i32
    %c0_i32_1 = arith.constant 0 : i32
    %4 = arith.cmpi ne, %3, %c0_i32_1 : i32
    scf.if %4 {
      %c0_31 = arith.constant 0 : index
      %c0_32 = arith.constant 0 : index
      %42 = vector.load %arg3[%c0_31, %c0_32] : memref<16x32xbf16, #tpu.memory_space<vmem>>, vector<16x32xbf16>
      %c0_33 = arith.constant 0 : index
      %c0_34 = arith.constant 0 : index
      %43 = vector.load %arg4[%c0_33, %c0_34] : memref<32x16xbf16, #tpu.memory_space<vmem>>, vector<32x16xbf16>
      %cst_35 = arith.constant dense<0.000000e+00> : vector<16x16xf32>
      %44 = tpu.matmul %42, %43, %cst_35 {dimension_numbers = #tpu.dot_dimension_numbers<[1], [0], [0], [1], [0, 0, 1, 1], [], []>} : vector<16x32xbf16>, vector<32x16xbf16>, vector<16x16xf32> -> vector<16x16xf32>
      %c0_36 = arith.constant 0 : index
      %c0_37 = arith.constant 0 : index
      %45 = vector.load %arg5[%c0_36, %c0_37] : memref<1x16xf32, #tpu.memory_space<vmem>>, vector<1x16xf32>
      %46 = vector.broadcast %45 : vector<1x16xf32> to vector<16x16xf32>
      %47 = arith.addf %44, %46 : vector<16x16xf32>
      %cst_38 = arith.constant dense<0.000000e+00> : vector<16xf32>
      %48 = vector.multi_reduction <add>, %47, %cst_38 [1] : vector<16x16xf32> to vector<16xf32>
      %49 = vector.shape_cast %48 : vector<16xf32> to vector<16x1xf32>
      %cst_39 = arith.constant 1.600000e+01 : f32
      %50 = vector.broadcast %cst_39 : f32 to vector<16x1xf32>
      %51 = arith.divf %49, %50 : vector<16x1xf32>
      %52 = vector.broadcast %51 : vector<16x1xf32> to vector<16x16xf32>
      %53 = arith.subf %47, %52 : vector<16x16xf32>
      %54 = arith.mulf %53, %53 : vector<16x16xf32>
      %cst_40 = arith.constant dense<0.000000e+00> : vector<16xf32>
      %55 = vector.multi_reduction <add>, %54, %cst_40 [1] : vector<16x16xf32> to vector<16xf32>
      %56 = vector.shape_cast %55 : vector<16xf32> to vector<16x1xf32>
      %cst_41 = arith.constant 1.600000e+01 : f32
      %57 = vector.broadcast %cst_41 : f32 to vector<16x1xf32>
      %58 = arith.divf %56, %57 : vector<16x1xf32>
      %59 = vector.broadcast %51 : vector<16x1xf32> to vector<16x16xf32>
      %60 = arith.subf %47, %59 : vector<16x16xf32>
      %cst_42 = arith.constant 9.99999974E-6 : f32
      %61 = vector.broadcast %cst_42 : f32 to vector<16x1xf32>
      %62 = arith.addf %58, %61 : vector<16x1xf32>
      %63 = math.rsqrt %62 : vector<16x1xf32>
      %64 = vector.broadcast %63 : vector<16x1xf32> to vector<16x16xf32>
      %65 = arith.mulf %60, %64 : vector<16x16xf32>
      %c0_43 = arith.constant 0 : index
      %c0_44 = arith.constant 0 : index
      %66 = vector.load %arg6[%c0_43, %c0_44] : memref<1x16xf32, #tpu.memory_space<vmem>>, vector<1x16xf32>
      %67 = vector.broadcast %66 : vector<1x16xf32> to vector<16x16xf32>
      %68 = arith.mulf %65, %67 : vector<16x16xf32>
      %c0_45 = arith.constant 0 : index
      %c0_46 = arith.constant 0 : index
      %69 = vector.load %arg7[%c0_45, %c0_46] : memref<1x16xf32, #tpu.memory_space<vmem>>, vector<1x16xf32>
      %70 = vector.broadcast %69 : vector<1x16xf32> to vector<16x16xf32>
      %71 = arith.addf %68, %70 : vector<16x16xf32>
      %cst_47 = arith.constant 5.000000e-01 : f32
      %72 = vector.broadcast %cst_47 : f32 to vector<16x16xf32>
      %73 = arith.mulf %72, %71 : vector<16x16xf32>
      %cst_48 = arith.constant 0.707106769 : f32
      %74 = vector.broadcast %cst_48 : f32 to vector<16x16xf32>
      %75 = arith.mulf %71, %74 : vector<16x16xf32>
      %76 = math.erf %75 : vector<16x16xf32>
      %cst_49 = arith.constant 1.000000e+00 : f32
      %77 = vector.broadcast %cst_49 : f32 to vector<16x16xf32>
      %78 = arith.addf %77, %76 : vector<16x16xf32>
      %79 = arith.mulf %73, %78 : vector<16x16xf32>
      %80 = arith.truncf %79 : vector<16x16xf32> to vector<16x16xbf16>
      %c0_50 = arith.constant 0 : index
      %c0_51 = arith.constant 0 : index
      %81 = vector.load %arg8[%c0_50, %c0_51] : memref<16x4xbf16, #tpu.memory_space<vmem>>, vector<16x4xbf16>
      %cst_52 = arith.constant dense<0.000000e+00> : vector<16x4xf32>
      %82 = tpu.matmul %80, %81, %cst_52 {dimension_numbers = #tpu.dot_dimension_numbers<[1], [0], [0], [1], [0, 0, 1, 1], [], []>} : vector<16x16xbf16>, vector<16x4xbf16>, vector<16x4xf32> -> vector<16x4xf32>
      %c0_53 = arith.constant 0 : index
      %c0_54 = arith.constant 0 : index
      %83 = vector.load %arg9[%c0_53, %c0_54] : memref<1x4xf32, #tpu.memory_space<vmem>>, vector<1x4xf32>
      %84 = vector.broadcast %83 : vector<1x4xf32> to vector<16x4xf32>
      %85 = arith.addf %82, %84 : vector<16x4xf32>
      %cst_55 = arith.constant dense<0xFF800000> : vector<16xf32>
      %86 = vector.multi_reduction <maximumf>, %85, %cst_55 [1] : vector<16x4xf32> to vector<16xf32>
      %87 = vector.shape_cast %86 : vector<16xf32> to vector<16x1xf32>
      %88 = vector.broadcast %87 : vector<16x1xf32> to vector<16x4xf32>
      %89 = arith.subf %85, %88 : vector<16x4xf32>
      %90 = math.exp %89 : vector<16x4xf32>
      %91 = tpu.iota {dimensions = array<i32: 1>} : vector<16x4xi32>
      %cst_56 = arith.constant 0.000000e+00 : f32
      %92 = vector.broadcast %cst_56 : f32 to vector<16x1xf32>
      %cst_57 = arith.constant dense<0xFF800000> : vector<16xf32>
      %93 = vector.multi_reduction <maximumf>, %90, %cst_57 [1] : vector<16x4xf32> to vector<16xf32>
      %94 = vector.shape_cast %93 : vector<16xf32> to vector<16x1xf32>
      %95 = vector.broadcast %94 : vector<16x1xf32> to vector<16x4xf32>
      %96 = arith.cmpf oeq, %90, %95 : vector<16x4xf32>
      %c4_i32 = arith.constant 4 : i32
      %97 = vector.broadcast %c4_i32 : i32 to vector<16x4xi32>
      %98 = arith.select %96, %91, %97 : vector<16x4xi1>, vector<16x4xi32>
      %cst_58 = arith.constant dense<2147483647> : vector<16xi32>
      %99 = vector.multi_reduction <minsi>, %98, %cst_58 [1] : vector<16x4xi32> to vector<16xi32>
      %100 = vector.shape_cast %99 : vector<16xi32> to vector<16x1xi32>
      %101 = vector.broadcast %100 : vector<16x1xi32> to vector<16x4xi32>
      %102 = arith.cmpi eq, %91, %101 : vector<16x4xi32>
      %103 = arith.extui %102 : vector<16x4xi1> to vector<16x4xi32>
      %104 = arith.sitofp %103 : vector<16x4xi32> to vector<16x4xf32>
      %105 = arith.addf %92, %94 : vector<16x1xf32>
      %cst_59 = arith.constant 0.000000e+00 : f32
      %106 = vector.broadcast %cst_59 : f32 to vector<16x4xf32>
      %107 = arith.cmpf ogt, %104, %106 : vector<16x4xf32>
      %cst_60 = arith.constant 0xFF800000 : f32
      %108 = vector.broadcast %cst_60 : f32 to vector<16x4xf32>
      %109 = arith.select %107, %108, %90 : vector<16x4xi1>, vector<16x4xf32>
      %cst_61 = arith.constant dense<0xFF800000> : vector<16xf32>
      %110 = vector.multi_reduction <maximumf>, %109, %cst_61 [1] : vector<16x4xf32> to vector<16xf32>
      %111 = vector.shape_cast %110 : vector<16xf32> to vector<16x1xf32>
      %112 = vector.broadcast %111 : vector<16x1xf32> to vector<16x4xf32>
      %113 = arith.cmpf oeq, %109, %112 : vector<16x4xf32>
      %c4_i32_62 = arith.constant 4 : i32
      %114 = vector.broadcast %c4_i32_62 : i32 to vector<16x4xi32>
      %115 = arith.select %113, %91, %114 : vector<16x4xi1>, vector<16x4xi32>
      %cst_63 = arith.constant dense<2147483647> : vector<16xi32>
      %116 = vector.multi_reduction <minsi>, %115, %cst_63 [1] : vector<16x4xi32> to vector<16xi32>
      %117 = vector.shape_cast %116 : vector<16xi32> to vector<16x1xi32>
      %118 = vector.broadcast %117 : vector<16x1xi32> to vector<16x4xi32>
      %119 = arith.cmpi eq, %91, %118 : vector<16x4xi32>
      %120 = arith.extui %119 : vector<16x4xi1> to vector<16x4xi32>
      %121 = arith.sitofp %120 : vector<16x4xi32> to vector<16x4xf32>
      %122 = arith.addf %105, %111 : vector<16x1xf32>
      %cst_64 = arith.constant 1.000000e+00 : f32
      %123 = vector.broadcast %cst_64 : f32 to vector<16x1xf32>
      %124 = arith.divf %123, %122 : vector<16x1xf32>
      %cst_65 = arith.constant 0.000000e+00 : f32
      %125 = vector.broadcast %cst_65 : f32 to vector<16x4xf32>
      %126 = arith.mulf %94, %124 : vector<16x1xf32>
      %127 = vector.broadcast %126 : vector<16x1xf32> to vector<16x4xf32>
      %128 = arith.mulf %104, %127 : vector<16x4xf32>
      %129 = arith.addf %125, %128 : vector<16x4xf32>
      %130 = arith.mulf %111, %124 : vector<16x1xf32>
      %131 = vector.broadcast %130 : vector<16x1xf32> to vector<16x4xf32>
      %132 = arith.mulf %121, %131 : vector<16x4xf32>
      %133 = arith.addf %129, %132 : vector<16x4xf32>
      %c0_66 = arith.constant 0 : index
      %c0_67 = arith.constant 0 : index
      %134 = vector.load %arg17[%c0_66, %c0_67] : memref<16x4xf32, #tpu.memory_space<vmem>>, vector<16x4xf32>
      tpu.vector_store %arg17[%c0_66, %c0_67], %133 {strides = array<i32>} : memref<16x4xf32, #tpu.memory_space<vmem>>, vector<16x4xf32>,
      %cst_68 = arith.constant 0.000000e+00 : f32
      %135 = vector.broadcast %cst_68 : f32 to vector<16x32xf32>
      %c0_69 = arith.constant 0 : index
      %c0_70 = arith.constant 0 : index
      %136 = vector.load %arg16[%c0_69, %c0_70] : memref<16x32xf32, #tpu.memory_space<vmem>>, vector<16x32xf32>
      tpu.vector_store %arg16[%c0_69, %c0_70], %135 {strides = array<i32>} : memref<16x32xf32, #tpu.memory_space<vmem>>, vector<16x32xf32>,
    } else {
    }
    %c0_i32_2 = arith.constant 0 : i32
    %5 = arith.cmpi eq, %arg2, %c0_i32_2 : i32
    %6 = arith.extui %5 : i1 to i32
    %c0_i32_3 = arith.constant 0 : i32
    %7 = arith.cmpi ne, %6, %c0_i32_3 : i32
    scf.if %7 {
      %42 = tpu.iota {dimensions = array<i32: 0>} : vector<4x1xi32>
      %43 = vector.broadcast %arg1 : i32 to vector<4x1xi32>
      %44 = arith.cmpi eq, %42, %43 : vector<4x1xi32>
      %45 = arith.extui %44 : vector<4x1xi1> to vector<4x1xi32>
      %46 = arith.sitofp %45 : vector<4x1xi32> to vector<4x1xf32>
      %c0_31 = arith.constant 0 : index
      %c0_32 = arith.constant 0 : index
      %47 = vector.load %arg17[%c0_31, %c0_32] : memref<16x4xf32, #tpu.memory_space<vmem>>, vector<16x4xf32>
      %cst_33 = arith.constant dense<0.000000e+00> : vector<16x1xf32>
      %48 = tpu.matmul %47, %46, %cst_33 {dimension_numbers = #tpu.dot_dimension_numbers<[1], [0], [0], [1], [0, 0, 1, 1], [], []>} : vector<16x4xf32>, vector<4x1xf32>, vector<16x1xf32> -> vector<16x1xf32>
      %c0_34 = arith.constant 0 : index
      %c0_35 = arith.constant 0 : index
      %49 = vector.load %arg18[%c0_34, %c0_35] : memref<16x1xf32, #tpu.memory_space<vmem>>, vector<16x1xf32>
      tpu.vector_store %arg18[%c0_34, %c0_35], %48 {strides = array<i32>} : memref<16x1xf32, #tpu.memory_space<vmem>>, vector<16x1xf32>,
      %c0_36 = arith.constant 0 : index
      %c0_37 = arith.constant 0 : index
      %50 = vector.load %arg16[%c0_36, %c0_37] : memref<16x32xf32, #tpu.memory_space<vmem>>, vector<16x32xf32>
      %c0_38 = arith.constant 0 : index
      %c0_39 = arith.constant 0 : index
      %c0_40 = arith.constant 0 : index
      %51 = vector.load %arg15[%c0_38, %c0_39, %c0_40] : memref<1x1x32xf32, #tpu.memory_space<vmem>>, vector<1x1x32xf32>
      %52 = vector.shape_cast %51 : vector<1x1x32xf32> to vector<1x32xf32>
      %c0_41 = arith.constant 0 : index
      %c0_42 = arith.constant 0 : index
      %53 = vector.load %arg18[%c0_41, %c0_42] : memref<16x1xf32, #tpu.memory_space<vmem>>, vector<16x1xf32>
      %54 = vector.broadcast %52 : vector<1x32xf32> to vector<16x32xf32>
      %55 = vector.broadcast %53 : vector<16x1xf32> to vector<16x32xf32>
      %56 = arith.mulf %54, %55 : vector<16x32xf32>
      %57 = arith.addf %50, %56 : vector<16x32xf32>
      %c0_43 = arith.constant 0 : index
      %c0_44 = arith.constant 0 : index
      %58 = vector.load %arg16[%c0_43, %c0_44] : memref<16x32xf32, #tpu.memory_space<vmem>>, vector<16x32xf32>
      tpu.vector_store %arg16[%c0_43, %c0_44], %57 {strides = array<i32>} : memref<16x32xf32, #tpu.memory_space<vmem>>, vector<16x32xf32>,
    } else {
    }
    %c0 = arith.constant 0 : index
    %c0_4 = arith.constant 0 : index
    %8 = vector.load %arg3[%c0, %c0_4] : memref<16x32xbf16, #tpu.memory_space<vmem>>, vector<16x32xbf16>
    %c0_5 = arith.constant 0 : index
    %c0_6 = arith.constant 0 : index
    %c0_7 = arith.constant 0 : index
    %9 = vector.load %arg10[%c0_5, %c0_6, %c0_7] : memref<1x32x64xbf16, #tpu.memory_space<vmem>>, vector<1x32x64xbf16>
    %10 = vector.shape_cast %9 : vector<1x32x64xbf16> to vector<32x64xbf16>
    %cst = arith.constant dense<0.000000e+00> : vector<16x64xf32>
    %11 = tpu.matmul %8, %10, %cst {dimension_numbers = #tpu.dot_dimension_numbers<[1], [0], [0], [1], [0, 0, 1, 1], [], []>} : vector<16x32xbf16>, vector<32x64xbf16>, vector<16x64xf32> -> vector<16x64xf32>
    %c0_8 = arith.constant 0 : index
    %c0_9 = arith.constant 0 : index
    %c0_10 = arith.constant 0 : index
    %12 = vector.load %arg11[%c0_8, %c0_9, %c0_10] : memref<1x1x64xf32, #tpu.memory_space<vmem>>, vector<1x1x64xf32>
    %13 = vector.shape_cast %12 : vector<1x1x64xf32> to vector<1x64xf32>
    %14 = vector.broadcast %13 : vector<1x64xf32> to vector<16x64xf32>
    %15 = arith.addf %11, %14 : vector<16x64xf32>
    %c0_11 = arith.constant 0 : index
    %c0_12 = arith.constant 0 : index
    %c0_13 = arith.constant 0 : index
    %16 = vector.load %arg12[%c0_11, %c0_12, %c0_13] : memref<1x32x64xbf16, #tpu.memory_space<vmem>>, vector<1x32x64xbf16>
    %17 = vector.shape_cast %16 : vector<1x32x64xbf16> to vector<32x64xbf16>
    %cst_14 = arith.constant dense<0.000000e+00> : vector<16x64xf32>
    %18 = tpu.matmul %8, %17, %cst_14 {dimension_numbers = #tpu.dot_dimension_numbers<[1], [0], [0], [1], [0, 0, 1, 1], [], []>} : vector<16x32xbf16>, vector<32x64xbf16>, vector<16x64xf32> -> vector<16x64xf32>
    %c0_15 = arith.constant 0 : index
    %c0_16 = arith.constant 0 : index
    %c0_17 = arith.constant 0 : index
    %19 = vector.load %arg13[%c0_15, %c0_16, %c0_17] : memref<1x1x64xf32, #tpu.memory_space<vmem>>, vector<1x1x64xf32>
    %20 = vector.shape_cast %19 : vector<1x1x64xf32> to vector<1x64xf32>
    %21 = vector.broadcast %20 : vector<1x64xf32> to vector<16x64xf32>
    %22 = arith.addf %18, %21 : vector<16x64xf32>
    %cst_18 = arith.constant 5.000000e-01 : f32
    %23 = vector.broadcast %cst_18 : f32 to vector<16x64xf32>
    %24 = arith.mulf %23, %22 : vector<16x64xf32>
    %cst_19 = arith.constant 0.707106769 : f32
    %25 = vector.broadcast %cst_19 : f32 to vector<16x64xf32>
    %26 = arith.mulf %22, %25 : vector<16x64xf32>
    %27 = math.erf %26 : vector<16x64xf32>
    %cst_20 = arith.constant 1.000000e+00 : f32
    %28 = vector.broadcast %cst_20 : f32 to vector<16x64xf32>
    %29 = arith.addf %28, %27 : vector<16x64xf32>
    %30 = arith.mulf %24, %29 : vector<16x64xf32>
    %31 = arith.mulf %15, %30 : vector<16x64xf32>
    %32 = arith.truncf %31 : vector<16x64xf32> to vector<16x64xbf16>
    %c0_21 = arith.constant 0 : index
    %c0_22 = arith.constant 0 : index
    %c0_23 = arith.constant 0 : index
    %33 = vector.load %arg14[%c0_21, %c0_22, %c0_23] : memref<1x64x32xbf16, #tpu.memory_space<vmem>>, vector<1x64x32xbf16>
    %34 = vector.shape_cast %33 : vector<1x64x32xbf16> to vector<64x32xbf16>
    %cst_24 = arith.constant dense<0.000000e+00> : vector<16x32xf32>
    %35 = tpu.matmul %32, %34, %cst_24 {dimension_numbers = #tpu.dot_dimension_numbers<[1], [0], [0], [1], [0, 0, 1, 1], [], []>} : vector<16x64xbf16>, vector<64x32xbf16>, vector<16x32xf32> -> vector<16x32xf32>
    %c0_25 = arith.constant 0 : index
    %c0_26 = arith.constant 0 : index
    %36 = vector.load %arg16[%c0_25, %c0_26] : memref<16x32xf32, #tpu.memory_space<vmem>>, vector<16x32xf32>
    %c0_27 = arith.constant 0 : index
    %c0_28 = arith.constant 0 : index
    %37 = vector.load %arg18[%c0_27, %c0_28] : memref<16x1xf32, #tpu.memory_space<vmem>>, vector<16x1xf32>
    %38 = vector.broadcast %37 : vector<16x1xf32> to vector<16x32xf32>
    %39 = arith.mulf %35, %38 : vector<16x32xf32>
    %40 = arith.addf %36, %39 : vector<16x32xf32>
    %c0_29 = arith.constant 0 : index
    %c0_30 = arith.constant 0 : index
    %41 = vector.load %arg16[%c0_29, %c0_30] : memref<16x32xf32, #tpu.memory_space<vmem>>, vector<16x32xf32>
    tpu.vector_store %arg16[%c0_29, %c0_30], %40 {strides = array<i32>} : memref<16x32xf32, #tpu.memory_space<vmem>>, vector<16x32xf32>,
    return
  }
  func.func @transform_0(%arg0: i32, %arg1: i32, %arg2: i32) -> (i32, i32) {
    %c0_i32 = arith.constant 0 : i32
    %c0_i32_0 = arith.constant 0 : i32
    return %arg0, %c0_i32 : i32, i32
  }
  func.func @transform_1(%arg0: i32, %arg1: i32, %arg2: i32) -> (i32, i32) {
    %c0_i32 = arith.constant 0 : i32
    %c0_i32_0 = arith.constant 0 : i32
    %c0_i32_1 = arith.constant 0 : i32
    return %c0_i32, %c0_i32_0 : i32, i32
  }
  func.func @transform_2(%arg0: i32, %arg1: i32, %arg2: i32) -> (i32, i32) {
    %c0_i32 = arith.constant 0 : i32
    %c0_i32_0 = arith.constant 0 : i32
    %c0_i32_1 = arith.constant 0 : i32
    return %c0_i32, %c0_i32_0 : i32, i32
  }
  func.func @transform_3(%arg0: i32, %arg1: i32, %arg2: i32) -> (i32, i32) {
    %c0_i32 = arith.constant 0 : i32
    %c0_i32_0 = arith.constant 0 : i32
    %c0_i32_1 = arith.constant 0 : i32
    return %c0_i32, %c0_i32_0 : i32, i32
  }
  func.func @transform_4(%arg0: i32, %arg1: i32, %arg2: i32) -> (i32, i32) {
    %c0_i32 = arith.constant 0 : i32
    %c0_i32_0 = arith.constant 0 : i32
    %c0_i32_1 = arith.constant 0 : i32
    return %c0_i32, %c0_i32_0 : i32, i32
  }
  func.func @transform_5(%arg0: i32, %arg1: i32, %arg2: i32) -> (i32, i32) {
    %c0_i32 = arith.constant 0 : i32
    %c0_i32_0 = arith.constant 0 : i32
    %c0_i32_1 = arith.constant 0 : i32
    return %c0_i32, %c0_i32_0 : i32, i32
  }
  func.func @transform_6(%arg0: i32, %arg1: i32, %arg2: i32) -> (i32, i32) {
    %c0_i32 = arith.constant 0 : i32
    %c0_i32_0 = arith.constant 0 : i32
    %c0_i32_1 = arith.constant 0 : i32
    return %c0_i32, %c0_i32_0 : i32, i32
  }
  func.func @transform_7(%arg0: i32, %arg1: i32, %arg2: i32) -> (i32, i32, i32) {
    %c0_i32 = arith.constant 0 : i32
    %c0_i32_0 = arith.constant 0 : i32
    return %arg1, %c0_i32, %arg2 : i32, i32, i32
  }
  func.func @transform_8(%arg0: i32, %arg1: i32, %arg2: i32) -> (i32, i32, i32) {
    %c0_i32 = arith.constant 0 : i32
    %c0_i32_0 = arith.constant 0 : i32
    return %arg1, %c0_i32, %arg2 : i32, i32, i32
  }
  func.func @transform_9(%arg0: i32, %arg1: i32, %arg2: i32) -> (i32, i32, i32) {
    %c0_i32 = arith.constant 0 : i32
    %c0_i32_0 = arith.constant 0 : i32
    return %arg1, %c0_i32, %arg2 : i32, i32, i32
  }
  func.func @transform_10(%arg0: i32, %arg1: i32, %arg2: i32) -> (i32, i32, i32) {
    %c0_i32 = arith.constant 0 : i32
    %c0_i32_0 = arith.constant 0 : i32
    return %arg1, %c0_i32, %arg2 : i32, i32, i32
  }
  func.func @transform_11(%arg0: i32, %arg1: i32, %arg2: i32) -> (i32, i32, i32) {
    %c0_i32 = arith.constant 0 : i32
    %c0_i32_0 = arith.constant 0 : i32
    return %arg1, %arg2, %c0_i32 : i32, i32, i32
  }
  func.func @transform_12(%arg0: i32, %arg1: i32, %arg2: i32) -> (i32, i32, i32) {
    %c0_i32 = arith.constant 0 : i32
    %c0_i32_0 = arith.constant 0 : i32
    %c0_i32_1 = arith.constant 0 : i32
    return %arg1, %c0_i32, %c0_i32_0 : i32, i32, i32
  }
  func.func @transform_13(%arg0: i32, %arg1: i32, %arg2: i32) -> (i32, i32) {
    %c0_i32 = arith.constant 0 : i32
    %c0_i32_0 = arith.constant 0 : i32
    return %arg0, %c0_i32 : i32, i32
  }
}

</mosaic_0001>

<bundles_post_ra>
// kernel: tpu_custom_call.1
= control target key start
LH: loop header
LB: loop body
LE: loop exit
PB: predicated region body
PF: predicated region fallthrough
CT: control target
= control target key end

     0   :  { %s2016_s0 = inlined_call_operand.vmem [shape: bf16[16,32], index: 0, kind: input, shape index: {}]   ;;  %s2017_s1 = inlined_call_operand.vmem [shape: bf16[32,16], index: 1, kind: input, shape index: {}]   ;;  %s2018_s2 = inlined_call_operand.vmem [shape: f32[1,16], index: 2, kind: input, shape index: {}]   ;;  %s2019_s3 = inlined_call_operand.vmem [shape: f32[1,16], index: 3, kind: input, shape index: {}]   ;;  %s2020_s4 = inlined_call_operand.vmem [shape: f32[1,16], index: 4, kind: input, shape index: {}]   ;;  %s2021_s5 = inlined_call_operand.vmem [shape: bf16[16,4], index: 5, kind: input, shape index: {}]   ;;  %s2022_s6 = inlined_call_operand.vmem [shape: f32[1,4], index: 6, kind: input, shape index: {}]   ;;  %s2023_s7 = inlined_call_operand.vmem [shape: bf16[4,32,64], index: 7, kind: input, shape index: {}]   ;;  %s2024_s8 = inlined_call_operand.vmem [shape: f32[4,1,64], index: 8, kind: input, shape index: {}]   ;;  %s2025_s9 = inlined_call_operand.vmem [shape: bf16[4,32,64], index: 9, kind: input, shape index: {}]   ;;  %s2026_s10 = inlined_call_operand.vmem [shape: f32[4,1,64], index: 10, kind: input, shape index: {}]   ;;  %s2027_s11 = inlined_call_operand.vmem [shape: bf16[4,64,32], index: 11, kind: input, shape index: {}]   ;;  %s2028_s12 = inlined_call_operand.vmem [shape: f32[4,1,32], index: 12, kind: input, shape index: {}]   ;;  %s2029_s13 = inlined_call_operand.hbm [shape: f32[16,32], index: 13, kind: output, shape index: {}]  }
   0x1   :  { %2032 = sst [smem:[#allocation10_spill]] %s2023_s7 }
   0x2   :  { %2033 = sst [smem:[#allocation11_spill]] %s2029_s13 }
   0x3   :  { %18 = vsyncpa [#allocation5], 0  ;;  %s1784_s25 = smov 0   ;;  %s1786_s26 = smov 0  }
   0x4   :  { %s1788_s27 = smov 0  }
   0x5 LB: > { %2034 = sst [smem:[#allocation7_spill]] %s1701_s26  ;;  %s39_s29 = sadd.s32 1, %s1701_s26  ;;  %s1705_s27 = sphi %s1788_s27, %s24_s27   ;;  %s1701_s26 = sphi %s1786_s26, %s2044_s26   ;;  %s1697_s25 = sphi %s1784_s25, %s2043_s25  }
   0x6   : > { %2035 = sst [smem:[#allocation8_spill]] %s1705_s27  ;;  %p41_p0 = scmp.ge.s32.totalorder %s39_s29, 4 }
   0x7   : > { %p1485_p1 = scmp.ge.s32.totalorder %s1705_s27, 1  ;;  %p489_p2 = scmp.lt.s32.totalorder %s1705_s27, 5 }
   0x8   : > { %s2046_s29 = smov (%p41_p0, %s39_s29), 0 }
   0x9   : > { %2036 = sst [smem:[#allocation9_spill]] %s2046_s29  ;;  %p490_p3 = pnand %p1485_p1, %p489_p2 }
   0xa   : > { %p574_p4 = scmp.lt.s32.totalorder (!%p490_p3), %s1697_s25, 3  ;;  %p617_p5 = scmp.eq.s32.totalorder (!%p490_p3), %s1697_s25, 0 }
   0xb   : > { %493 = sbr.rel (%p490_p3) target bundleno = 1833 (0x729), region = 72  ;;  %s2037_s7 = sld [smem:[#allocation10_spill]] (!%p490_p3) }
  0x10   : > { %s1808_s30 = scalar_select %p574_p4, %s1697_s25, 3  ;;  %v1572_v0 = vld [vmem:[%s2017_s1 + $0x8] sm:$0xff] (%p617_p5)  ;;  %vm650_vm0 = vcmask (%p617_p5), 261120   ;;  %v1707_v1 = vmov (%p617_p5), 0.0   ;;  %v1571_v2 = vld [vmem:[%s2017_s1] sm:$0xff] (%p617_p5)  ;;  %vm668_vm1 = vcmask (%p617_p5), 130048  }
  0x11   : > { %622 = sbr.rel (!%p617_p5) target bundleno = 1480 (0x5c8), region = 76  ;;  %1009 = vst.msk [vmem:[#allocation4] sm:$0xff] (%p617_p5), %vm650_vm0, %v1707_v1  ;;  %660 = vmatpush.bf16.msra.mxu0 (%p617_p5), %v1572_v0  ;;  %v1570_v3 = vld [vmem:[%s2016_s0] sm:$0xff] (%p617_p5)  ;;  %v1708_v11 = vmov (%p617_p5), 16.0  }
  0x12   : > { %s1566_s14 = sshll.u32 %s1808_s30, 4  ;;  %s601_s29 = scalar_lea.vmem %s2026_s10, %s1808_s30  ;;  %1010 = vst.msk [vmem:[#allocation4 + $0x8] sm:$0xff] (%p617_p5), %vm650_vm0, %v1707_v1  ;;  %v1620_v4 = vld [vmem:[%s2018_s2] ss:$0 sm:$0xff] (%p617_p5)  ;;  %1624 = vrcp.f32 (%p617_p5), %v1708_v11 }
  0x13   : > { %s1818_s20 = scalar_lea.vmem %s2037_s7, %s1566_s14  ;;  %s1823_s23 = scalar_lea.vmem %s2025_s9, %s1566_s14  ;;  %v1573_v30 = vld [vmem:[%s2021_s5] sm:$0xff] (%p617_p5) }
  0x14   : > { %s1568_s26 = sshll.u32 %s1808_s30, 5  ;;  %s614_s18 = scalar_lea.vmem %s2028_s12, %s1808_s30  ;;  %843 = vmatpush.bf16.msra.mxu1 (%p617_p5), %v1573_v30  ;;  %v1621_v43 = vld [vmem:[%s2019_s3] ss:$0 sm:$0xff] (%p617_p5) }
  0x15   : > { %s1833_s15 = scalar_lea.vmem %s2027_s11, %s1568_s26  ;;  %661 = vmatpush.bf16.msra.mxu0 (%p617_p5), %v1571_v2  ;;  %v1622_v47 = vld [vmem:[%s2020_s4] ss:$0 sm:$0xff] (%p617_p5) }
  0x18   : > { %1505 = vmatmul.msk.bf16.vlgmr.msra.gmra.mxu0 %vm650_vm0, %v1570_v3  ;;  %v1625_v12 = vpop.eup %1624 }
  0x19   : > { %v676_v13 = vmul.f32 16.0, %v1625_v12  ;;  %vm680_vm2 = vweird.f32 %v1625_v12 }
  0x1b   : > { %v677_v14 = vsub.f32 1.0, %v676_v13 }
  0x1d   : > { %v678_v15 = vmul.f32 %v1625_v12, %v677_v14 }
  0x1f   : > { %v679_v16 = vadd.f32 %v1625_v12, %v678_v15 }
  0x21   : > { %v681_v17 = vsel %vm680_vm2, %v1625_v12, %v679_v16  ;;  %vm850_vm2 = vcmask 31744  }
  0x95   : > { %v663_v5 = vpop.f32.mrf.mxu0 }
  0x96   : > { %v664_v6 = vadd.f32 %v1620_v4, %v663_v5 }
  0x98   : > { %v669_v7 = vsel %vm668_vm1, %v664_v6, 0.0 }
  0x99   : > { %670 = vadd.xlane.f32.xlu0 %v669_v7 }
  0x9d   : > { %v665_v8 = vpop.f32.mrf.mxu0 }
  0x9e   : > { %v666_v9 = vadd.f32 %v1620_v4, %v665_v8 }
  0xa0   : > { %v672_v10 = vsel %vm668_vm1, %v666_v9, 0.0 }
  0xa1   : > { %673 = vadd.xlane.f32.xlu0 %v672_v10 }
 0x10c   : > { %v671_v18 = vpop.xlane.xlu0 %670 }
 0x10d   : > { %v682_v19 = vmul.f32 %v681_v17, %v671_v18 }
 0x10f   : > { %v684_v20 = vsub.f32 %v664_v6, %v682_v19 }
 0x111   : > { %v686_v21 = vmul.f32 %v684_v20, %v684_v20 }
 0x113   : > { %v688_v22 = vsel %vm668_vm1, %v686_v21, 0.0 }
 0x114   : > { %689 = vadd.xlane.f32.xlu1 %v688_v22  ;;  %v674_v23 = vpop.xlane.xlu0 %673 }
 0x115   : > { %v683_v24 = vmul.f32 %v681_v17, %v674_v23 }
 0x117   : > { %v685_v25 = vsub.f32 %v666_v9, %v683_v24 }
 0x119   : > { %v687_v26 = vmul.f32 %v685_v25, %v685_v25 }
 0x11b   : > { %v691_v27 = vsel %vm668_vm1, %v687_v26, 0.0 }
 0x11c   : > { %692 = vadd.xlane.f32.xlu1 %v691_v27 }
 0x187   : > { %v690_v28 = vpop.xlane.xlu1 %689 }
 0x188   : > { %v694_v29 = vmul.f32 %v690_v28, %v681_v17 }
 0x18a   : > { %v696_v31 = vadd.f32 1e-05, %v694_v29 }
 0x18c   : > { %1626 = vrsqrt.f32 %v696_v31  ;;  %vm704_vm4 = vweird.f32 %v696_v31 }
 0x18f   : > { %v693_v32 = vpop.xlane.xlu1 %692 }
 0x190   : > { %v695_v33 = vmul.f32 %v693_v32, %v681_v17 }
 0x192   : > { %v1627_v34 = vpop.eup %1626  ;;  %v697_v35 = vadd.f32 1e-05, %v695_v33 }
 0x193   : > { %v699_v36 = vmul.f32 %v1627_v34, %v696_v31  ;;  %vm705_vm3 = vweird.f32 %v1627_v34 }
 0x194   : > { %1628 = vrsqrt.f32 %v697_v35  ;;  %vm706_vm5 = vmor %vm704_vm4, %vm705_vm3  ;;  %vm714_vm7 = vweird.f32 %v697_v35 }
 0x195   : > { %v700_v37 = vmul.f32 %v1627_v34, %v699_v36 }
 0x197   : > { %v701_v38 = vmul.f32 0.5, %v700_v37 }
 0x199   : > { %v702_v39 = vsub.f32 1.5, %v701_v38 }
 0x19a   : > { %v1629_v40 = vpop.eup %1628 }
 0x19b   : > { %v703_v41 = vmul.f32 %v1627_v34, %v702_v39  ;;  %v709_v42 = vmul.f32 %v1629_v40, %v697_v35  ;;  %vm715_vm6 = vweird.f32 %v1629_v40 }
 0x19c   : > { %vm716_vm8 = vmor %vm714_vm7, %vm715_vm6 }
 0x19d   : > { %v707_v44 = vsel %vm706_vm5, %v1627_v34, %v703_v41  ;;  %v710_v45 = vmul.f32 %v1629_v40, %v709_v42 }
 0x19e   : > { %v718_v46 = vmul.f32 %v707_v44, %v684_v20 }
 0x19f   : > { %v711_v48 = vmul.f32 0.5, %v710_v45 }
 0x1a0   : > { %v724_v49 = vmul.f32 %v1621_v43, %v718_v46 }
 0x1a1   : > { %v712_v50 = vsub.f32 1.5, %v711_v48 }
 0x1a2   : > { %v1866_v51 = vadd.f32 %v1622_v47, %v724_v49 }
 0x1a3   : > { %v713_v52 = vmul.f32 %v1629_v40, %v712_v50 }
 0x1a4   : > { %v1869_v53 = vmul.f32 0.70710677, %v1866_v51 }
 0x1a5   : > { %v717_v54 = vsel %vm716_vm8, %v1629_v40, %v713_v52 }
 0x1a6   : > { %v719_v55 = vmul.f32 %v717_v54, %v685_v25  ;;  %v736_v56 = vmul.f32 %v1869_v53, %v1869_v53 }
 0x1a8   : > { %v725_v57 = vmul.f32 %v1621_v43, %v719_v55  ;;  %v737_v58 = vmin.f32 %v736_v56, 16.0 }
 0x1aa   : > { %v1873_v59 = vadd.f32 %v1622_v47, %v725_v57  ;;  %v738_v60 = vmul.f32 2.1237322e-06, %v737_v58  ;;  %v749_v61 = vmul.f32 3.8918573e-05, %v737_v58 }
 0x1ac   : > { %v1876_v62 = vmul.f32 0.70710677, %v1873_v59  ;;  %v739_v63 = vadd.f32 0.00028619796, %v738_v60  ;;  %v750_v0 = vadd.f32 0.001143296, %v749_v61 }
 0x1ae   : > { %v776_v2 = vmul.f32 %v1876_v62, %v1876_v62  ;;  %v740_v3 = vmul.f32 %v739_v63, %v737_v58  ;;  %v751_v4 = vmul.f32 %v750_v0, %v737_v58 }
 0x1b0   : > { %v777_v5 = vmin.f32 %v776_v2, 16.0  ;;  %v752_v6 = vadd.f32 0.014752088, %v751_v4  ;;  %v741_v9 = vadd.f32 0.0036580483, %v740_v3 }
 0x1b2   : > { %v778_v7 = vmul.f32 2.1237322e-06, %v777_v5  ;;  %v789_v8 = vmul.f32 3.8918573e-05, %v777_v5  ;;  %v753_v10 = vmul.f32 %v752_v6, %v737_v58  ;;  %v742_v16 = vmul.f32 %v741_v9, %v737_v58 }
 0x1b4   : > { %v779_v11 = vadd.f32 0.00028619796, %v778_v7  ;;  %v790_v12 = vadd.f32 0.001143296, %v789_v8  ;;  %v754_v13 = vadd.f32 0.112945676, %v753_v10 }
 0x1b5   : > { %v743_v22 = vadd.f32 0.05243302, %v742_v16  ;;  %v732_v7 = vmul.f32 0.5, %v1866_v51  ;;  %v733_v8 = vmul.f32 0.5, %v1873_v59 }
 0x1b6   : > { %v780_v14 = vmul.f32 %v779_v11, %v777_v5  ;;  %v791_v15 = vmul.f32 %v790_v12, %v777_v5  ;;  %v755_v17 = vmul.f32 %v754_v13, %v737_v58 }
 0x1b7   : > { %v744_v28 = vmul.f32 %v743_v22, %v737_v58 }
 0x1b8   : > { %v781_v18 = vadd.f32 0.0036580483, %v780_v14  ;;  %v792_v19 = vadd.f32 0.014752088, %v791_v15  ;;  %v756_v20 = vadd.f32 0.4994258, %v755_v17 }
 0x1b9   : > { %v745_v32 = vadd.f32 0.18741608, %v744_v28 }
 0x1ba   : > { %v793_v21 = vmul.f32 %v792_v19, %v777_v5  ;;  %v757_v23 = vmul.f32 %v756_v20, %v737_v58  ;;  %v782_v24 = vmul.f32 %v781_v18, %v777_v5 }
 0x1bb   : > { %v746_v37 = vmul.f32 %v745_v32, %v737_v58 }
 0x1bc   : > { %v794_v25 = vadd.f32 0.112945676, %v793_v21  ;;  %v758_v26 = vadd.f32 1.0, %v757_v23  ;;  %v783_v29 = vadd.f32 0.05243302, %v782_v24 }
 0x1bd   : > { %v747_v43 = vadd.f32 1.1283791, %v746_v37 }
 0x1be   : > { %v795_v27 = vmul.f32 %v794_v25, %v777_v5  ;;  %1630 = vrcp.f32 %v758_v26  ;;  %v784_v33 = vmul.f32 %v783_v29, %v777_v5  ;;  %v770_v40 = vand.u32 2147483648, %v758_v26 }
 0x1bf   : > { %v768_v42 = vand.u32 2147483647, %v758_v26  ;;  %vm764_vm10 = vweird.f32 %v758_v26  ;;  %v748_v50 = vmul.f32 %v747_v43, %v1869_v53 }
 0x1c0   : > { %v796_v30 = vadd.f32 0.4994258, %v795_v27  ;;  %v785_v39 = vadd.f32 0.18741608, %v784_v33  ;;  %v771_v47 = vor.u32 1.1754944e-38, %v770_v40  ;;  %v863_v27 = vlaneseq }
 0x1c1   : > { %vm769_vm12 = vcmp.eq.f32.partialorder %v768_v42, 8.507059e+37 }
 0x1c2   : > { %v797_v31 = vmul.f32 %v796_v30, %v777_v5  ;;  %v786_v46 = vmul.f32 %v785_v39, %v777_v5  ;;  %v1892_v28 = vand.u32 127, %v863_v27 }
 0x1c4   : > { %v798_v34 = vadd.f32 1.0, %v797_v31  ;;  %v1631_v35 = vpop.eup %1630  ;;  %v787_v55 = vadd.f32 1.1283791, %v786_v46 }
 0x1c5   : > { %v760_v36 = vmul.f32 %v1631_v35, %v758_v26  ;;  %vm765_vm9 = vweird.f32 %v1631_v35 }
 0x1c6   : > { %1632 = vrcp.f32 %v798_v34  ;;  %vm766_vm11 = vmor %vm764_vm10, %vm765_vm9  ;;  %v810_v56 = vand.u32 2147483648, %v798_v34  ;;  %v808_v60 = vand.u32 2147483647, %v798_v34  ;;  %vm804_vm14 = vweird.f32 %v798_v34 }
 0x1c7   : > { %v761_v38 = vsub.f32 1.0, %v760_v36  ;;  %v788_v2 = vmul.f32 %v787_v55, %v1876_v62  ;;  %v1623_v62 = vld [vmem:[%s2022_s6] ss:$0 sm:$0xff] }
 0x1c8   : > { %v811_v63 = vor.u32 1.1754944e-38, %v810_v56  ;;  %vm809_vm0 = vcmp.eq.f32.partialorder %v808_v60, 8.507059e+37 }
 0x1c9   : > { %v762_v41 = vmul.f32 %v1631_v35, %v761_v38 }
 0x1cb   : > { %v763_v45 = vadd.f32 %v1631_v35, %v762_v41 }
 0x1cc   : > { %v1633_v44 = vpop.eup %1632 }
 0x1cd   : > { %v800_v48 = vmul.f32 %v1633_v44, %v798_v34  ;;  %v767_v49 = vsel %vm766_vm11, %v1631_v35, %v763_v45  ;;  %vm805_vm13 = vweird.f32 %v1633_v44 }
 0x1ce   : > { %v772_v52 = vsel %vm769_vm12, %v771_v47, %v767_v49  ;;  %vm806_vm15 = vmor %vm804_vm14, %vm805_vm13 }
 0x1cf   : > { %v801_v54 = vsub.f32 1.0, %v800_v48  ;;  %v773_v57 = vmul.f32 %v772_v52, %v748_v50 }
 0x1d1   : > { %v802_v58 = vmul.f32 %v1633_v44, %v801_v54  ;;  %v1506_v0 = vclamps-f32 %v773_v57, 1.0 }
 0x1d3   : > { %v803_v61 = vadd.f32 %v1633_v44, %v802_v58  ;;  %v816_v6 = vadd.f32 1.0, %v1506_v0 }
 0x1d5   : > { %v807_v3 = vsel %vm806_vm15, %v1633_v44, %v803_v61  ;;  %v818_v10 = vmul.f32 %v816_v6, %v732_v7 }
 0x1d6   : > { %v812_v4 = vsel %vm809_vm0, %v811_v63, %v807_v3 }
 0x1d7   : > { %v813_v5 = vmul.f32 %v812_v4, %v788_v2 }
 0x1d9   : > { %v1507_v53 = vclamps-f32 %v813_v5, 1.0 }
 0x1db   : > { %v817_v9 = vadd.f32 1.0, %v1507_v53 }
 0x1dd   : > { %v819_v11 = vmul.f32 %v817_v9, %v733_v8 }
 0x1df   : > { %v820_v12 = vpack.c.bf16 %v819_v11, %v818_v10 }
 0x1e1   : > { %1512 = vmatmul.msk.bf16.vlgmr.msra.gmra.mxu1 %vm668_vm1, %v820_v12 }
 0x25e   : > { %v845_v13 = vpop.f32.mrf.mxu1 }
 0x25f   : > { %v846_v14 = vadd.f32 %v1623_v62, %v845_v13 }
 0x261   : > { %v851_v15 = vsel %vm850_vm2, %v846_v14, -inf }
 0x262   : > { %852 = vmax.xlane.f32.xlu2 %v851_v15 }
 0x266   : > { %v847_v16 = vpop.f32.mrf.mxu1 }
 0x267   : > { %v848_v51 = vadd.f32 %v1623_v62, %v847_v16 }
 0x269   : > { %v854_v59 = vsel %vm850_vm2, %v848_v51, -inf }
 0x26a   : > { %855 = vmax.xlane.f32.xlu2 %v854_v59 }
 0x2d5   : > { %v853_v17 = vpop.xlane.xlu2 %852 }
 0x2d6   : > { %v857_v18 = vsub.f32 %v846_v14, %v853_v17 }
 0x2d8   : > { %v859_v19 = vmul.f32 1.442695, %v857_v18 }
 0x2da   : > { %1634 = vpow2.f32 %v859_v19 }
 0x2dd   : > { %v856_v20 = vpop.xlane.xlu2 %855 }
 0x2de   : > { %v858_v21 = vsub.f32 %v848_v51, %v856_v20 }
 0x2e0   : > { %v1635_v22 = vpop.eup %1634  ;;  %v861_v23 = vmul.f32 1.442695, %v858_v21 }
 0x2e1   : > { %v865_v24 = vsel %vm850_vm2, %v1635_v22, -inf }
 0x2e2   : > { %1636 = vpow2.f32 %v861_v23  ;;  %866 = vmax.xlane.f32.xlu0 %v865_v24 }
 0x2e8   : > { %v1637_v25 = vpop.eup %1636 }
 0x2e9   : > { %v868_v26 = vsel %vm850_vm2, %v1637_v25, -inf }
 0x2ea   : > { %869 = vmax.xlane.f32.xlu1 %v868_v26 }
 0x355   : > { %v1894_v29 = vpop.xlane.xlu0 %866 }
 0x356   : > { %vm871_vm1 = vcmp.eq.f32.partialorder %v1635_v22, %v1894_v29 }
 0x357   : > { %v873_v30 = vsel %vm871_vm1, %v1892_v28, 4 }
 0x358   : > { %v875_v31 = vsel %vm850_vm2, %v873_v30, 2147483647 }
 0x359   : > { %v877_v32 = vshra.s32 %v875_v31, 16  ;;  %v876_v39 = vand.u32 65535, %v875_v31 }
 0x35b   : > { %v879_v33 = vcvt.s32.f32 %v877_v32  ;;  %v878_v41 = vcvt.s32.f32 %v876_v39 }
 0x35d   : > { %880 = vmin.xlane.f32.xlu2 %v879_v33  ;;  %v1899_v34 = vpop.xlane.xlu1 %869 }
 0x35e   : > { %vm872_vm3 = vcmp.eq.f32.partialorder %v1637_v25, %v1899_v34 }
 0x35f   : > { %v874_v35 = vsel %vm872_vm3, %v1892_v28, 4 }
 0x360   : > { %v890_v36 = vsel %vm850_vm2, %v874_v35, 2147483647 }
 0x361   : > { %v892_v37 = vshra.s32 %v890_v36, 16  ;;  %v891_v43 = vand.u32 65535, %v890_v36 }
 0x363   : > { %v894_v38 = vcvt.s32.f32 %v892_v37  ;;  %v893_v45 = vcvt.s32.f32 %v891_v43 }
 0x365   : > { %895 = vmin.xlane.f32.xlu0 %v894_v38 }
 0x3d0   : > { %v881_v40 = vpop.xlane.xlu2 %880 }
 0x3d1   : > { %vm882_vm4 = vcmp.eq.f32.partialorder %v879_v33, %v881_v40  ;;  %v887_v47 = vcvt.f32.s32 %v881_v40 }
 0x3d2   : > { %v883_v42 = vsel %vm882_vm4, %v878_v41, inf }
 0x3d3   : > { %884 = vmin.xlane.f32.xlu1 %v883_v42  ;;  %v888_v49 = vshll.u32 %v887_v47, 16 }
 0x3d8   : > { %v896_v44 = vpop.xlane.xlu0 %895 }
 0x3d9   : > { %vm897_vm5 = vcmp.eq.f32.partialorder %v894_v38, %v896_v44  ;;  %v902_v54 = vcvt.f32.s32 %v896_v44 }
 0x3da   : > { %v898_v46 = vsel %vm897_vm5, %v893_v45, inf }
 0x3db   : > { %899 = vmin.xlane.f32.xlu2 %v898_v46  ;;  %v903_v58 = vshll.u32 %v902_v54, 16 }
 0x446   : > { %v885_v48 = vpop.xlane.xlu1 %884 }
 0x447   : > { %v886_v50 = vcvt.f32.s32 %v885_v48 }
 0x449   : > { %v889_v52 = vadd.s32 %v888_v49, %v886_v50 }
 0x44b   : > { %vm905_vm6 = vcmp.eq.s32.totalorder %v1892_v28, %v889_v52 }
 0x44c   : > { %v1906_v55 = vsel %vm905_vm6, 1.0, %v1707_v1 }
 0x44d   : > { %vm913_vm7 = vcmp.gt.f32.partialorder %v1906_v55, 0.0 }
 0x44e   : > { %v900_v56 = vpop.xlane.xlu2 %899  ;;  %v915_v57 = vsel %vm913_vm7, -inf, %v1635_v22 }
 0x44f   : > { %v901_v60 = vcvt.f32.s32 %v900_v56  ;;  %v917_v61 = vsel %vm850_vm2, %v915_v57, -inf }
 0x450   : > { %918 = vmax.xlane.f32.xlu0 %v917_v61 }
 0x451   : > { %v904_v63 = vadd.s32 %v903_v58, %v901_v60 }
 0x453   : > { %vm906_vm8 = vcmp.eq.s32.totalorder %v1892_v28, %v904_v63 }
 0x454   : > { %v1912_v0 = vsel %vm906_vm8, 1.0, %v1707_v1 }
 0x455   : > { %vm914_vm9 = vcmp.gt.f32.partialorder %v1912_v0, 0.0 }
 0x456   : > { %v916_v2 = vsel %vm914_vm9, -inf, %v1637_v25 }
 0x457   : > { %v920_v3 = vsel %vm850_vm2, %v916_v2, -inf }
 0x458   : > { %921 = vmax.xlane.f32.xlu1 %v920_v3 }
 0x4c3   : > { %v919_v4 = vpop.xlane.xlu0 %918 }
 0x4c4   : > { %vm923_vm10 = vcmp.eq.f32.partialorder %v915_v57, %v919_v4  ;;  %v963_v18 = vadd.f32 %v919_v4, %v1894_v29 }
 0x4c5   : > { %v925_v5 = vsel %vm923_vm10, %v1892_v28, 4 }
 0x4c6   : > { %v927_v53 = vsel %vm850_vm2, %v925_v5, 2147483647  ;;  %1638 = vrcp.f32 %v963_v18  ;;  %v976_v30 = vand.u32 2147483648, %v963_v18  ;;  %vm970_vm15 = vweird.f32 %v963_v18 }
 0x4c7   : > { %v929_v6 = vshra.s32 %v927_v53, 16  ;;  %v928_v62 = vand.u32 65535, %v927_v53  ;;  %v974_v31 = vand.u32 2147483647, %v963_v18 }
 0x4c8   : > { %v977_v36 = vor.u32 1.1754944e-38, %v976_v30 }
 0x4c9   : > { %v931_v7 = vcvt.s32.f32 %v929_v6  ;;  %v930_v14 = vcvt.s32.f32 %v928_v62  ;;  %vm975_vm1 = vcmp.eq.f32.partialorder %v974_v31, 8.507059e+37 }
 0x4cb   : > { %v1918_v8 = vpop.xlane.xlu1 %921  ;;  %932 = vmin.xlane.f32.xlu2 %v931_v7 }
 0x4cc   : > { %vm924_vm11 = vcmp.eq.f32.partialorder %v916_v2, %v1918_v8  ;;  %v964_v19 = vadd.f32 %v1918_v8, %v1899_v34  ;;  %v1639_v20 = vpop.eup %1638 }
 0x4cd   : > { %v926_v9 = vsel %vm924_vm11, %v1892_v28, 4  ;;  %v966_v21 = vmul.f32 %v1639_v20, %v963_v18  ;;  %vm971_vm14 = vweird.f32 %v1639_v20 }
 0x4ce   : > { %v942_v10 = vsel %vm850_vm2, %v926_v9, 2147483647  ;;  %1640 = vrcp.f32 %v964_v19  ;;  %vm972_vm0 = vmor %vm970_vm15, %vm971_vm14  ;;  %v991_v42 = vand.u32 2147483648, %v964_v19  ;;  %vm985_vm4 = vweird.f32 %v964_v19 }
 0x4cf   : > { %v944_v11 = vshra.s32 %v942_v10, 16  ;;  %v943_v16 = vand.u32 65535, %v942_v10  ;;  %v967_v22 = vsub.f32 1.0, %v966_v21  ;;  %v989_v44 = vand.u32 2147483647, %v964_v19 }
 0x4d0   : > { %v992_v49 = vor.u32 1.1754944e-38, %v991_v42 }
 0x4d1   : > { %v946_v12 = vcvt.s32.f32 %v944_v11  ;;  %v945_v59 = vcvt.s32.f32 %v943_v16  ;;  %v968_v24 = vmul.f32 %v1639_v20, %v967_v22  ;;  %vm990_vm7 = vcmp.eq.f32.partialorder %v989_v44, 8.507059e+37 }
 0x4d3   : > { %947 = vmin.xlane.f32.xlu0 %v946_v12  ;;  %v969_v26 = vadd.f32 %v1639_v20, %v968_v24 }
 0x4d4   : > { %v1641_v23 = vpop.eup %1640 }
 0x4d5   : > { %v981_v25 = vmul.f32 %v1641_v23, %v964_v19  ;;  %v973_v32 = vsel %vm972_vm0, %v1639_v20, %v969_v26  ;;  %vm986_vm3 = vweird.f32 %v1641_v23 }
 0x4d6   : > { %v978_v37 = vsel %vm975_vm1, %v977_v36, %v973_v32  ;;  %vm987_vm5 = vmor %vm985_vm4, %vm986_vm3 }
 0x4d7   : > { %v982_v27 = vsub.f32 1.0, %v981_v25  ;;  %v995_v43 = vmul.f32 %v978_v37, %v1894_v29  ;;  %v1001_v46 = vmul.f32 %v978_v37, %v919_v4 }
 0x4d9   : > { %v983_v33 = vmul.f32 %v1641_v23, %v982_v27  ;;  %v997_v52 = vmul.f32 %v1906_v55, %v995_v43 }
 0x4db   : > { %v984_v39 = vadd.f32 %v1641_v23, %v983_v33 }
 0x4dd   : > { %v988_v47 = vsel %vm987_vm5, %v1641_v23, %v984_v39 }
 0x4de   : > { %v993_v56 = vsel %vm990_vm7, %v992_v49, %v988_v47 }
 0x4df   : > { %v996_v61 = vmul.f32 %v993_v56, %v1899_v34  ;;  %v1002_v2 = vmul.f32 %v993_v56, %v1918_v8 }
 0x4e1   : > { %v998_v55 = vmul.f32 %v1912_v0, %v996_v61 }
 0x53e   : > { %v933_v13 = vpop.xlane.xlu2 %932 }
 0x53f   : > { %vm934_vm12 = vcmp.eq.f32.partialorder %v931_v7, %v933_v13  ;;  %v939_v35 = vcvt.f32.s32 %v933_v13 }
 0x540   : > { %v935_v15 = vsel %vm934_vm12, %v930_v14, inf }
 0x541   : > { %936 = vmin.xlane.f32.xlu1 %v935_v15  ;;  %v940_v40 = vshll.u32 %v939_v35, 16 }
 0x546   : > { %v948_v51 = vpop.xlane.xlu0 %947 }
 0x547   : > { %vm949_vm13 = vcmp.eq.f32.partialorder %v946_v12, %v948_v51  ;;  %v954_v48 = vcvt.f32.s32 %v948_v51 }
 0x548   : > { %v950_v17 = vsel %vm949_vm13, %v945_v59, inf }
 0x549   : > { %951 = vmin.xlane.f32.xlu2 %v950_v17  ;;  %v955_v58 = vshll.u32 %v954_v48, 16 }
 0x5b4   : > { %v937_v38 = vpop.xlane.xlu1 %936 }
 0x5b5   : > { %v938_v41 = vcvt.f32.s32 %v937_v38 }
 0x5b7   : > { %v941_v45 = vadd.s32 %v940_v40, %v938_v41 }
 0x5b9   : > { %vm957_vm6 = vcmp.eq.s32.totalorder %v1892_v28, %v941_v45 }
 0x5ba   : > { %v1515_v50 = vsel %vm957_vm6, 1.0, %v1707_v1 }
 0x5bb   : > { %v1003_v54 = vmul.f32 %v1515_v50, %v1001_v46 }
 0x5bc   : > { %v952_v57 = vpop.xlane.xlu2 %951 }
 0x5bd   : > { %v1005_v29 = vadd.f32 %v1003_v54, %v997_v52  ;;  %v953_v60 = vcvt.f32.s32 %v952_v57 }
 0x5bf   : > { %1007 = vst.msk [vmem:[#allocation2] sm:$0xff] %vm850_vm2, %v1005_v29  ;;  %v956_v63 = vadd.s32 %v955_v58, %v953_v60 }
 0x5c1   : > { %vm958_vm8 = vcmp.eq.s32.totalorder %v1892_v28, %v956_v63 }
 0x5c2   : > { %v1516_v3 = vsel %vm958_vm8, 1.0, %v1707_v1 }
 0x5c3   : > { %v1004_v4 = vmul.f32 %v1516_v3, %v1002_v2 }
 0x5c5   : > { %v1006_v5 = vadd.f32 %v1004_v4, %v998_v55 }
 0x5c7   : > { %1008 = vst.msk [vmem:[#allocation2 + $0x8] sm:$0xff] %vm850_vm2, %v1006_v5 }
 0x5c8 PF: > { %v1578_v34 = vld [vmem:[%s1823_s23 + $0x8] sm:$0xff]  ;;  %v1014_v53 = vlaneseq  ;;  %v1016_v7 = vstv %s1697_s25  ;;  %v1577_v28 = vld [vmem:[%s1823_s23] sm:$0xff]  ;;  %vm1029_vm9 = vcmask 1043456   ;;  %vm1022_vm2 = vcmask 31744   ;;  %v1582_v36 = vld [vmem:[%s1833_s15 + $0x18] sm:$0xff]  ;;  %s2039_s17 = sld [smem:[#allocation8_spill]] }
 0x5c9   : > { %v1576_v6 = vld [vmem:[%s1818_s20 + $0x8] sm:$0xff]  ;;  %1155 = vmatpush.bf16.msra.mxu2 %v1578_v34  ;;  %v1575_v1 = vld [vmem:[%s1818_s20] sm:$0xff]  ;;  %v1709_v10 = vmov 0.0   ;;  %vm1081_vm11 = vcmask 261120   ;;  %1294 = vmatpush.bf16.msra.mxu3 %v1582_v36  ;;  %v1581_v44 = vld [vmem:[%s1833_s15 + $0x10] sm:$0xff]  ;;  %vm1056_vm12 = vcmask 7168  }
 0x5ca   : > { %v1015_v8 = vshrl.u32 %v1014_v53, 7  ;;  %1121 = vmatpush.bf16.msra.mxu1 %v1576_v6  ;;  %v1020_v0 = vld [vmem:[#allocation2] sm:$0xff]  ;;  %v1580_v54 = vld [vmem:[%s1833_s15 + $0x8] sm:$0xff]  ;;  %v1710_v63 = vmov 0   ;;  %vm1286_vm6 = vcmask 523264   ;;  %s2040_s24 = sld [smem:[#allocation11_spill]] }
 0x5cb   : > { %v1574_v9 = vld [vmem:[%s2016_s0] sm:$0xff]  ;;  %1642 = vset.pattern.permute.xlu0 %v1710_v63  ;;  %1643 = vset.pattern.permute.xlu1 %v1710_v63  ;;  %s1712_s28 = smov 128   ;;  %s1713_s14 = smov 8  }
 0x5cc   : > { %vm1017_vm10 = vcmp.eq.s32.totalorder %v1015_v8, %v1016_v7  ;;  %v1644_v62 = vld [vmem:[%s601_s29] ss:$0 sm:$0xff] }
 0x5cd   : > { %v1517_v11 = vsel %vm1017_vm10, 1.0, %v1709_v10  ;;  %1156 = vmatpush.bf16.msra.mxu2 %v1577_v28  ;;  %1295 = vmatpush.bf16.msra.mxu3 %v1581_v44  ;;  %v1579_v60 = vld [vmem:[%s1833_s15] sm:$0xff]  ;;  %s2038_s15 = scalar_lea.vmem %s2024_s8, %s1808_s30  ;;  %s1711_s30 = smov [#allocation4]  }
 0x5ce   : > { %1518 = vmatpush.msk.msra.mxu0 %vm1029_vm9, %v1517_v11  ;;  %1122 = vmatpush.bf16.msra.mxu1 %v1575_v1  ;;  %v1021_v12 = vld [vmem:[#allocation2 + $0x8] sm:$0xff]  ;;  %s2041_s19 = sadd.s32 4294967295, %s2039_s17  }
 0x5cf   : > { %1519 = vmatmul.msk.f32.vlgmr.msra.gmra.mxu0 %vm1022_vm2, %v1020_v0  ;;  %p1587_p6 = scmp.eq.s32.totalorder %s2041_s19, 3 }
 0x5d0   : > { %1542 = vmatmul.msk.bf16.vlgmr.msra.gmra.mxu2 %vm1081_vm11, %v1574_v9  ;;  %s1334_s16 = sshll.u32 %s2040_s24, 4  ;;  %s1335_s16 = int_to_ptr.hbm [resolvable:$true] %s1334_s16 }
 0x5d1   : > { %1533 = vmatmul.msk.bf16.vlgmr.msra.gmra.mxu1 %vm1081_vm11, %v1574_v9  ;;  %1296 = vmatpush.bf16.msra.mxu3 %v1580_v54 }
 0x5d5   : > { %1297 = vmatpush.bf16.msra.mxu3 %v1579_v60 }
 0x5d7   : > { %1520 = vmatmul.msk.f32.gmra.mxu0 %vm1022_vm2, %v1021_v12 }
 0x64c   : > { %v1050_v50 = vpop.f32.mrf.mxu0 }
 0x64d   : > { %1057 = vst.msk [vmem:[#allocation3] sm:$0xff] %vm1056_vm12, %v1050_v50 }
 0x653   : > { %v1158_v13 = vpop.f32.mrf.mxu2 }
 0x654   : > { %v1952_v14 = vadd.f32 %v1644_v62, %v1158_v13  ;;  %v1053_v4 = vpop.f32.mrf.mxu0  ;;  %v1062_v5 = vld [vmem:[#allocation3] sm:$0xff] }
 0x655   : > { %1058 = vst.msk [vmem:[#allocation3 + $0x8] sm:$0xff] %vm1056_vm12, %v1053_v4  ;;  %1069 = vperm.xlu0 %1642, %v1062_v5   ;;  %1310 = vperm.xlu1 %1643, %v1062_v5  }
 0x656   : > { %v1955_v15 = vmul.f32 0.70710677, %v1952_v14 }
 0x658   : > { %v1167_v16 = vmul.f32 %v1955_v15, %v1955_v15 }
 0x65a   : > { %v1168_v51 = vmin.f32 %v1167_v16, 16.0 }
 0x65b   : > { %v1160_v59 = vpop.f32.mrf.mxu2 }
 0x65c   : > { %v1169_v17 = vmul.f32 2.1237322e-06, %v1168_v51  ;;  %v1180_v18 = vmul.f32 3.8918573e-05, %v1168_v51  ;;  %v1959_v19 = vadd.f32 %v1644_v62, %v1160_v59  ;;  %v1063_v62 = vld [vmem:[#allocation3 + $0x8] sm:$0xff] }
 0x65d   : > { %1074 = vperm.xlu0 %1642, %v1063_v62   ;;  %1315 = vperm.xlu1 %1643, %v1063_v62  }
 0x65e   : > { %v1170_v20 = vadd.f32 0.00028619796, %v1169_v17  ;;  %v1181_v21 = vadd.f32 0.001143296, %v1180_v18  ;;  %v1962_v22 = vmul.f32 0.70710677, %v1959_v19 }
 0x660   : > { %v1171_v23 = vmul.f32 %v1170_v20, %v1168_v51  ;;  %v1182_v24 = vmul.f32 %v1181_v21, %v1168_v51  ;;  %v1207_v25 = vmul.f32 %v1962_v22, %v1962_v22 }
 0x662   : > { %v1183_v26 = vadd.f32 0.014752088, %v1182_v24  ;;  %v1966_v27 = vmin.f32 %v1207_v25, 16.0  ;;  %v1172_v30 = vadd.f32 0.0036580483, %v1171_v23  ;;  %v1124_v25 = vpop.f32.mrf.mxu1 }
 0x664   : > { %v1184_v31 = vmul.f32 %v1183_v26, %v1168_v51  ;;  %v1209_v32 = vmul.f32 2.1237322e-06, %v1966_v27  ;;  %v1220_v33 = vmul.f32 3.8918573e-05, %v1966_v27  ;;  %v1173_v39 = vmul.f32 %v1172_v30, %v1168_v51 }
 0x666   : > { %v1185_v35 = vadd.f32 0.112945676, %v1184_v31  ;;  %v1210_v37 = vadd.f32 0.00028619796, %v1209_v32  ;;  %v1221_v38 = vadd.f32 0.001143296, %v1220_v33 }
 0x667   : > { %v1174_v46 = vadd.f32 0.05243302, %v1173_v39 }
 0x668   : > { %v1186_v40 = vmul.f32 %v1185_v35, %v1168_v51  ;;  %v1211_v41 = vmul.f32 %v1210_v37, %v1966_v27  ;;  %v1222_v42 = vmul.f32 %v1221_v38, %v1966_v27  ;;  %v1645_v38 = vld [vmem:[%s2038_s15] ss:$0 sm:$0xff] }
 0x669   : > { %v1175_v57 = vmul.f32 %v1174_v46, %v1168_v51  ;;  %v1125_v44 = vadd.f32 %v1645_v38, %v1124_v25 }
 0x66a   : > { %v1187_v43 = vadd.f32 0.4994258, %v1186_v40  ;;  %v1223_v45 = vadd.f32 0.014752088, %v1222_v42  ;;  %v1212_v48 = vadd.f32 0.0036580483, %v1211_v41  ;;  %v1126_v42 = vpop.f32.mrf.mxu1 }
 0x66b   : > { %v1176_v2 = vadd.f32 0.18741608, %v1175_v57  ;;  %v1163_v40 = vmul.f32 0.5, %v1952_v14  ;;  %v1127_v46 = vadd.f32 %v1645_v38, %v1126_v42  ;;  %v1059_v14 = vld [vmem:[#allocation4] sm:$0xff] }
 0x66c   : > { %v1188_v47 = vmul.f32 %v1187_v43, %v1168_v51  ;;  %v1224_v49 = vmul.f32 %v1223_v45, %v1966_v27  ;;  %v1213_v58 = vmul.f32 %v1212_v48, %v1966_v27  ;;  %v1164_v43 = vmul.f32 0.5, %v1959_v19  ;;  %v1060_v19 = vld [vmem:[#allocation4 + $0x8] sm:$0xff] }
 0x66d   : > { %v1177_v7 = vmul.f32 %v1176_v2, %v1168_v51 }
 0x66e   : > { %v1189_v52 = vadd.f32 1.0, %v1188_v47  ;;  %v1225_v56 = vadd.f32 0.112945676, %v1224_v49  ;;  %v1214_v3 = vadd.f32 0.05243302, %v1213_v58 }
 0x66f   : > { %v1178_v10 = vadd.f32 1.1283791, %v1177_v7 }
 0x670   : > { %1647 = vrcp.f32 %v1189_v52  ;;  %v1226_v29 = vmul.f32 %v1225_v56, %v1966_v27  ;;  %v1215_v28 = vmul.f32 %v1214_v3, %v1966_v27  ;;  %v1201_v1 = vand.u32 2147483648, %v1189_v52 }
 0x671   : > { %v1199_v9 = vand.u32 2147483647, %v1189_v52  ;;  %vm1195_vm14 = vweird.f32 %v1189_v52  ;;  %v1179_v51 = vmul.f32 %v1178_v10, %v1955_v15 }
 0x672   : > { %v1227_v61 = vadd.f32 0.4994258, %v1226_v29  ;;  %v1216_v11 = vadd.f32 0.18741608, %v1215_v28  ;;  %v1202_v13 = vor.u32 1.1754944e-38, %v1201_v1 }
 0x673   : > { %vm1200_vm0 = vcmp.eq.f32.partialorder %v1199_v9, 8.507059e+37 }
 0x674   : > { %v1228_v55 = vmul.f32 %v1227_v61, %v1966_v27  ;;  %v1217_v18 = vmul.f32 %v1216_v11, %v1966_v27 }
 0x676   : > { %v1648_v34 = vpop.eup %1647  ;;  %v1229_v6 = vadd.f32 1.0, %v1228_v55  ;;  %v1218_v26 = vadd.f32 1.1283791, %v1217_v18 }
 0x677   : > { %v1191_v53 = vmul.f32 %v1648_v34, %v1189_v52  ;;  %vm1196_vm13 = vweird.f32 %v1648_v34  ;;  %v1646_v52 = vld [vmem:[%s614_s18] ss:$0 sm:$0xff]  ;;  %s1332_s18 = sshll.u32 %s1711_s30, 4  ;;  %s1333_s18 = int_to_ptr.vmem [resolvable:$true] %s1332_s18 }
 0x678   : > { %1649 = vrcp.f32 %v1229_v6  ;;  %vm1197_vm15 = vmor %vm1195_vm14, %vm1196_vm13  ;;  %v1241_v24 = vand.u32 2147483648, %v1229_v6  ;;  %v1239_v31 = vand.u32 2147483647, %v1229_v6  ;;  %vm1235_vm3 = vweird.f32 %v1229_v6 }
 0x679   : > { %v1192_v8 = vsub.f32 1.0, %v1191_v53  ;;  %v1219_v15 = vmul.f32 %v1218_v26, %v1962_v22 }
 0x67a   : > { %v1242_v35 = vor.u32 1.1754944e-38, %v1241_v24  ;;  %vm1240_vm5 = vcmp.eq.f32.partialorder %v1239_v31, 8.507059e+37 }
 0x67b   : > { %v1193_v0 = vmul.f32 %v1648_v34, %v1192_v8 }
 0x67d   : > { %v1194_v12 = vadd.f32 %v1648_v34, %v1193_v0 }
 0x67e   : > { %v1650_v16 = vpop.eup %1649 }
 0x67f   : > { %v1198_v59 = vsel %vm1197_vm15, %v1648_v34, %v1194_v12  ;;  %v1231_v20 = vmul.f32 %v1650_v16, %v1229_v6  ;;  %vm1236_vm1 = vweird.f32 %v1650_v16 }
 0x680   : > { %v1203_v17 = vsel %vm1200_vm0, %v1202_v13, %v1198_v59  ;;  %vm1237_vm4 = vmor %vm1235_vm3, %vm1236_vm1 }
 0x681   : > { %v1204_v21 = vmul.f32 %v1203_v17, %v1179_v51  ;;  %v1232_v23 = vsub.f32 1.0, %v1231_v20 }
 0x683   : > { %v1233_v30 = vmul.f32 %v1650_v16, %v1232_v23  ;;  %v1543_v33 = vclamps-f32 %v1204_v21, 1.0 }
 0x685   : > { %v1234_v32 = vadd.f32 %v1650_v16, %v1233_v30  ;;  %v1247_v39 = vadd.f32 1.0, %v1543_v33 }
 0x687   : > { %v1238_v36 = vsel %vm1237_vm4, %v1650_v16, %v1234_v32  ;;  %v1249_v45 = vmul.f32 %v1247_v39, %v1163_v40 }
 0x688   : > { %v1243_v27 = vsel %vm1240_vm5, %v1242_v35, %v1238_v36 }
 0x689   : > { %v1244_v37 = vmul.f32 %v1243_v27, %v1219_v15  ;;  %v1251_v48 = vmul.f32 %v1249_v45, %v1125_v44 }
 0x68b   : > { %v1544_v41 = vclamps-f32 %v1244_v37, 1.0 }
 0x68d   : > { %v1248_v22 = vadd.f32 1.0, %v1544_v41 }
 0x68f   : > { %v1250_v47 = vmul.f32 %v1248_v22, %v1164_v43 }
 0x691   : > { %v1252_v49 = vmul.f32 %v1250_v47, %v1127_v46 }
 0x693   : > { %v1253_v50 = vpack.c.bf16 %v1252_v49, %v1251_v48 }
 0x695   : > { %1561 = vmatmul.msk.bf16.vlgmr.msra.gmra.mxu3 %vm1286_vm6, %v1253_v50 }
 0x6c7   : > { %v1070_v54 = vpop.permute.xlu0 %1069  ;;  %v1311_v61 = vpop.permute.xlu1 %1310 }
 0x6c8   : > { %v1077_v56 = vmul.f32 %v1646_v52, %v1070_v54 }
 0x6ca   : > { %v1079_v57 = vadd.f32 %v1077_v56, %v1059_v14 }
 0x6cc   : > { %1082 = vst.msk [vmem:[#allocation4] sm:$0xff] %vm1081_vm11, %v1079_v57 }
 0x6cf   : > { %v1075_v58 = vpop.permute.xlu0 %1074  ;;  %v1316_v4 = vpop.permute.xlu1 %1315 }
 0x6d0   : > { %v1078_v29 = vmul.f32 %v1646_v52, %v1075_v58 }
 0x6d2   : > { %v1080_v60 = vadd.f32 %v1078_v29, %v1060_v19 }
 0x6d3   : > { %v1304_v2 = vld [vmem:[#allocation4] sm:$0xff] }
 0x6d4   : > { %1083 = vst.msk [vmem:[#allocation4 + $0x8] sm:$0xff] %vm1081_vm11, %v1080_v60 }
 0x6db   : > { %v1305_v53 = vld [vmem:[#allocation4 + $0x8] sm:$0xff] }
 0x718   : > { %v1299_v63 = vpop.f32.mrf.mxu3 }
 0x719   : > { %v1318_v3 = vmul.f32 %v1311_v61, %v1299_v63 }
 0x71b   : > { %v1320_v55 = vadd.f32 %v1318_v3, %v1304_v2 }
 0x71d   : > { %1322 = vst.msk [vmem:[#allocation4] sm:$0xff] %vm1081_vm11, %v1320_v55 }
 0x720   : > { %v1301_v5 = vpop.f32.mrf.mxu3 }
 0x721   : > { %v1319_v34 = vmul.f32 %v1316_v4, %v1301_v5 }
 0x723   : > { %v1321_v6 = vadd.f32 %v1319_v34, %v1305_v53 }
 0x725   : > { %1323 = vst.msk [vmem:[#allocation4 + $0x8] sm:$0xff] %vm1081_vm11, %v1321_v6 }
 0x726   : > { %1584 = dma.vmem_to_hbm [thread:$0]  (%p1587_p6), %s1333_s18, 256, %s1335_s16, [#allocation5], %s1712_s28, %s1712_s28, %s1713_s14  }
 0x727   : > { %1692 = dma.done.wait (%p1587_p6), [#allocation5], 256  }
 0x728   : > { %1694 = vsyncadd (%p1587_p6), [#allocation5], 4294967040 }
 0x729 PF: > { %s2042_s13 = sld [smem:[#allocation8_spill]] }
 0x72a   : > { %s2043_s25 = sld [smem:[#allocation7_spill]] }
 0x72b   : > { %s2044_s26 = sld [smem:[#allocation9_spill]] }
 0x72f   : > { %s24_s27 = sadd.s32 1, %s2042_s13  }
 0x730   : > { %p21_p7 = scmp.ge.s32.totalorder %s24_s27, 6  }
 0x732   :  { %23 = sbr.rel (!%p21_p7) target bundleno = 5 (0x5), region = 126 }
 0x737   :  { %1351 = vsyncpa [#allocation5], 1 }
 0x738   :  { %1353 = vsyncpa [#allocation5 + $0x1], 1 }

</bundles_post_ra>
